<compile_context>
chip_gen: v7x
topology: tpu7x:2x2x1
jax: 0.10.0
libtpu: 0.0.40
codegen_flags: <defaults>
</compile_context>

<pallas_src>
import functools

import jax
import jax.numpy as jnp
from jax.experimental import pallas as pl
from jax.experimental.pallas import tpu as pltpu

EPS = 1e-5          # nn.BatchNorm1d default eps
LANES = 128         # lane width; padded dims are multiples of this
TARGET_BM = 512     # max batch tile (sweepable 512-1024; VMEM cost is small)


def _round_up(x, m):
    return ((x + m - 1) // m) * m


def _cdiv(a, b):
    return -(-a // b)


# ---------------------------------------------------------------------------
# Kernel: x(BM, Dp) f32 -> cast bf16 -> 3x [matmul + bias + ReLU] -> matmul + bias
#         -> (BM, 128) f32.  All weights/biases are fully resident blocks.
# ---------------------------------------------------------------------------
def mlp_kernel(x_ref,
               w1_ref, b1_ref,
               w2_ref, b2_ref,
               w3_ref, b3_ref,
               w4_ref, b4_ref,
               o_ref):

    def layer(h, w_ref, b_ref, relu):
        y = jnp.dot(h, w_ref[...], preferred_element_type=jnp.float32) + b_ref[...]
        if relu:
            y = jnp.maximum(y, 0.0)
        return y

    # f32 -> bf16 cast in-kernel (VPU work hidden under MXU); avoids a bf16 copy in HBM.
    h = x_ref[...].astype(jnp.bfloat16)                               # (BM, Dp)
    h = layer(h, w1_ref, b1_ref, relu=True).astype(jnp.bfloat16)      # (BM, 256)
    h = layer(h, w2_ref, b2_ref, relu=True).astype(jnp.bfloat16)      # (BM, 128)
    h = layer(h, w3_ref, b3_ref, relu=True).astype(jnp.bfloat16)      # (BM, 128) (64 padded)
    o_ref[...] = layer(h, w4_ref, b4_ref, relu=False)                 # (BM, 128) f32


# ---------------------------------------------------------------------------
# Parameter init (PyTorch-equivalent shapes/defaults) and BN folding + padding.
# Linear weights are stored transposed as (in, out).
# ---------------------------------------------------------------------------
def init_params(input_dim, n_classes, key):
    dims = [input_dim, 256, 128, 64, n_classes]
    params = {}
    keys = jax.random.split(key, 8)
    for li in range(4):
        din, dout = dims[li], dims[li + 1]
        wk, bk = keys[2 * li], keys[2 * li + 1]
        bound = 1.0 / jnp.sqrt(din)
        params[f"w{li+1}"] = jax.random.uniform(wk, (din, dout), jnp.float32, -bound, bound)
        params[f"b{li+1}"] = jax.random.uniform(bk, (1, dout), jnp.float32, -bound, bound)
        if li < 3:  # BatchNorm1d after the first three linears (PyTorch defaults)
            params[f"g{li+1}"] = jnp.ones((1, dout), jnp.float32)
            params[f"be{li+1}"] = jnp.zeros((1, dout), jnp.float32)
            params[f"m{li+1}"] = jnp.zeros((1, dout), jnp.float32)
            params[f"v{li+1}"] = jnp.ones((1, dout), jnp.float32)
    return params


def fold_params(params, n_classes):
    """Fold eval-mode BatchNorm into the preceding linear and pad to MXU-friendly shapes.

      w' = w * (gamma * rsqrt(var+eps));  b' = (b - mean) * scale + beta
      * w1 rows padded to a multiple of 128 (lane-dense K for layer 1).
      * layer-3 width padded 64 -> 128 (zero cols), w4 rows padded to match (zero rows).
      * head columns padded to 128 lanes.
    Weights cast to bf16 (MXU operands); biases stay f32.
    """
    folded = {}
    for li in range(1, 4):
        scale = params[f"g{li}"] * jax.lax.rsqrt(params[f"v{li}"] + EPS)       # (1, dout)
        folded[f"w{li}"] = params[f"w{li}"] * scale
        folded[f"b{li}"] = ((params[f"b{li}"] - params[f"m{li}"]) * scale
                            + params[f"be{li}"]).astype(jnp.float32)

    # Pad input_dim (w1 rows) to a multiple of 128; wrapper pads x columns to match.
    din1 = folded["w1"].shape[0]
    dp = _round_up(max(din1, LANES), LANES)
    if dp != din1:
        folded["w1"] = (jnp.zeros((dp, folded["w1"].shape[1]), jnp.float32)
                        .at[:din1, :].set(folded["w1"]))

    # Pad layer-3 width 64 -> 128.  Padded units have zero weight and zero bias, so
    # they are exactly 0 after ReLU and meet zero-padded w4 rows -> numerics unchanged.
    h3 = folded["w3"].shape[1]
    h3p = _round_up(max(h3, LANES), LANES)
    if h3p != h3:
        folded["w3"] = (jnp.zeros((folded["w3"].shape[0], h3p), jnp.float32)
                        .at[:, :h3].set(folded["w3"]))
        folded["b3"] = jnp.zeros((1, h3p), jnp.float32).at[:, :h3].set(folded["b3"])

    # Head: pad rows to h3p and columns to a lane-dense multiple of 128.
    nout = _round_up(max(n_classes, LANES), LANES)
    w4 = (jnp.zeros((h3p, nout), jnp.float32)
          .at[:params["w4"].shape[0], :n_classes].set(params["w4"]))
    b4 = jnp.zeros((1, nout), jnp.float32).at[:, :n_classes].set(params["b4"])

    out = {}
    for li in range(1, 4):
        out[f"w{li}"] = folded[f"w{li}"].astype(jnp.bfloat16)
        out[f"b{li}"] = folded[f"b{li}"]
    out["w4"] = w4.astype(jnp.bfloat16)
    out["b4"] = b4
    return out


# ---------------------------------------------------------------------------
# Forward wrapper (jitted so the reshape/pad stay off the critical path).
# ---------------------------------------------------------------------------
@functools.partial(jax.jit, static_argnames=("n_classes",))
def improved_mlp_forward(x_nchw, folded, *, n_classes):
    B = x_nchw.shape[0]
    x = x_nchw.reshape(B, -1)                      # free view; stays f32 (cast is in-kernel)
    D = x.shape[1]
    Dp = folded["w1"].shape[0]
    nout = folded["w4"].shape[1]

    # Balanced batch tiling: padding waste < 8 rows per tile; >=2 grid steps once B > 8
    # so both v7x TensorCores get work (v5e/v6e unaffected).
    n_tiles = 1 if B <= 8 else max(2, _cdiv(B, TARGET_BM))
    bm = _round_up(_cdiv(B, n_tiles), 8)
    grid = _cdiv(B, bm)
    Bp = grid * bm

    if Bp != B or Dp != D:
        x = jnp.pad(x, ((0, Bp - B), (0, Dp - D)))

    def resident(a):  # fully-resident block, constant index_map across the grid
        return pl.BlockSpec(a.shape, lambda i: (0, 0))

    # TODO(synk): if v7x sweeps show exposed DMA on the x stream, add
    # pipeline_mode=pl.Buffered(3) to this BlockSpec (kept at default depth here).
    in_specs = [pl.BlockSpec((bm, Dp), lambda i: (i, 0))]
    args = [x]
    for li in range(1, 5):
        w, b = folded[f"w{li}"], folded[f"b{li}"]
        in_specs += [resident(w), resident(b)]
        args += [w, b]

    weight_bytes = sum(int(v.size) * v.dtype.itemsize for v in folded.values())
    flops = 2 * Bp * sum(int(folded[f"w{li}"].shape[0]) * int(folded[f"w{li}"].shape[1])
                         for li in range(1, 5))
    bytes_accessed = Bp * Dp * 4 + weight_bytes + Bp * nout * 4

    # Double-buffered x + output tiles + resident weights, with headroom; raises v5e's
    # 16 MiB scoped default when needed while staying well under v7x's 64 MiB physical.
    vmem_need = 2 * bm * Dp * 4 + 2 * bm * nout * 4 + 2 * weight_bytes
    vmem_limit = int(min(max(32 << 20, 2 * vmem_need), 48 << 20))

    out = pl.pallas_call(
        mlp_kernel,
        out_shape=jax.ShapeDtypeStruct((Bp, nout), jnp.float32),
        grid_spec=pltpu.PrefetchScalarGridSpec(
            num_scalar_prefetch=0,
            grid=(grid,),
            in_specs=in_specs,
            out_specs=pl.BlockSpec((bm, nout), lambda i: (i, 0)),
        ),
        compiler_params=pltpu.CompilerParams(
            dimension_semantics=("parallel",),
            vmem_limit_bytes=vmem_limit),
        cost_estimate=pl.CostEstimate(flops=flops, transcendentals=0,
                                      bytes_accessed=bytes_accessed),
    )(*args)

    return out[:B, :n_classes]


# ---------------------------------------------------------------------------
# References
# ---------------------------------------------------------------------------
def reference_forward_folded(x_nchw, folded, n_classes):
    """Matches the kernel's exact numerics (bf16 matmuls, f32 accum, folded/padded BN)."""
    h = x_nchw.reshape(x_nchw.shape[0], -1)
    Dp = folded["w1"].shape[0]
    if Dp != h.shape[1]:
        h = jnp.pad(h, ((0, 0), (0, Dp - h.shape[1])))
    h = h.astype(jnp.bfloat16)
    for li in range(1, 4):
        h = jnp.dot(h, folded[f"w{li}"], preferred_element_type=jnp.float32) + folded[f"b{li}"]
        h = jnp.maximum(h, 0.0).astype(jnp.bfloat16)
    out = jnp.dot(h, folded["w4"], preferred_element_type=jnp.float32) + folded["b4"]
    return out[:, :n_classes]


def reference_forward_f32(x_nchw, params):
    """Original (unfolded, full f32) eval-mode semantics of the PyTorch module."""
    h = x_nchw.reshape(x_nchw.shape[0], -1).astype(jnp.float32)
    for li in range(1, 4):
        h = h @ params[f"w{li}"] + params[f"b{li}"]
        h = (h - params[f"m{li}"]) * (
            params[f"g{li}"] / jnp.sqrt(params[f"v{li}"] + EPS)) + params[f"be{li}"]
        h = jnp.maximum(h, 0.0)
    return h @ params["w4"] + params["b4"]


if __name__ == "__main__":
    key = jax.random.PRNGKey(0)
    k_x, k_p = jax.random.split(key)

    B, C, H, W = 2, 4, 16, 16          # -> input_dim = 1024
    n_classes = 10
    input_dim = C * H * W

    x = jax.random.normal(k_x, (B, C, H, W), jnp.float32)
    params = init_params(input_dim, n_classes, k_p)
    folded = fold_params(params, n_classes)          # precomputed once (off hot path)

    out = improved_mlp_forward(x, folded, n_classes=n_classes)
    out = jax.block_until_ready(out)

    assert out.shape == (B, n_classes)

    # Exact-numerics check (same bf16/f32 pattern as the kernel).
    ref_bf16 = reference_forward_folded(x, folded, n_classes)
    assert jnp.allclose(out, ref_bf16, atol=1e-3, rtol=1e-3), "mismatch vs folded bf16 reference"

    # Semantics check vs the original full-f32 module math (bf16 quantization tolerance).
    ref_f32 = reference_forward_f32(x, params)
    assert jnp.allclose(out, ref_f32, atol=2e-2, rtol=2e-2), "mismatch vs f32 reference"

    print("KERNEL_OK")
</pallas_src>

<mosaic_0001>
module attributes {stable_mosaic.version = 11 : i64} {
  func.func @mlp_kernel(%arg0: i32, %arg1: memref<8x1024xf32, #tpu.memory_space<vmem>>, %arg2: memref<1024x256xbf16, #tpu.memory_space<vmem>>, %arg3: memref<1x256xf32, #tpu.memory_space<vmem>>, %arg4: memref<256x128xbf16, #tpu.memory_space<vmem>>, %arg5: memref<1x128xf32, #tpu.memory_space<vmem>>, %arg6: memref<128x128xbf16, #tpu.memory_space<vmem>>, %arg7: memref<1x128xf32, #tpu.memory_space<vmem>>, %arg8: memref<128x128xbf16, #tpu.memory_space<vmem>>, %arg9: memref<1x128xf32, #tpu.memory_space<vmem>>, %arg10: memref<8x128xf32, #tpu.memory_space<vmem>>) attributes {dimension_semantics = [#tpu.dimension_semantics<parallel>], iteration_bounds = array<i64: 1>, scalar_prefetch = 0 : i64, scratch_operands = 0 : i64, tpu.core_type = #tpu.core_type<tc>, window_params = [{transform_indices = @transform_0, window_bounds = array<i64: 8, 1024>}, {pipeline_mode = #tpu.pipeline_mode<synchronous>, transform_indices = @transform_1, window_bounds = array<i64: 1024, 256>}, {pipeline_mode = #tpu.pipeline_mode<synchronous>, transform_indices = @transform_2, window_bounds = array<i64: 1, 256>}, {pipeline_mode = #tpu.pipeline_mode<synchronous>, transform_indices = @transform_3, window_bounds = array<i64: 256, 128>}, {pipeline_mode = #tpu.pipeline_mode<synchronous>, transform_indices = @transform_4, window_bounds = array<i64: 1, 128>}, {pipeline_mode = #tpu.pipeline_mode<synchronous>, transform_indices = @transform_5, window_bounds = array<i64: 128, 128>}, {pipeline_mode = #tpu.pipeline_mode<synchronous>, transform_indices = @transform_6, window_bounds = array<i64: 1, 128>}, {pipeline_mode = #tpu.pipeline_mode<synchronous>, transform_indices = @transform_7, window_bounds = array<i64: 128, 128>}, {pipeline_mode = #tpu.pipeline_mode<synchronous>, transform_indices = @transform_8, window_bounds = array<i64: 1, 128>}, {transform_indices = @transform_9, window_bounds = array<i64: 8, 128>}]} {
    %c0 = arith.constant 0 : index
    %c0_0 = arith.constant 0 : index
    %0 = vector.load %arg1[%c0, %c0_0] : memref<8x1024xf32, #tpu.memory_space<vmem>>, vector<8x1024xf32>
    %1 = arith.truncf %0 : vector<8x1024xf32> to vector<8x1024xbf16>
    %c0_1 = arith.constant 0 : index
    %c0_2 = arith.constant 0 : index
    %2 = vector.load %arg2[%c0_1, %c0_2] : memref<1024x256xbf16, #tpu.memory_space<vmem>>, vector<1024x256xbf16>
    %cst = arith.constant dense<0.000000e+00> : vector<8x256xf32>
    %3 = tpu.matmul %1, %2, %cst {dimension_numbers = #tpu.dot_dimension_numbers<[1], [0], [0], [1], [0, 0, 1, 1], [], []>} : vector<8x1024xbf16>, vector<1024x256xbf16>, vector<8x256xf32> -> vector<8x256xf32>
    %c0_3 = arith.constant 0 : index
    %c0_4 = arith.constant 0 : index
    %4 = vector.load %arg3[%c0_3, %c0_4] : memref<1x256xf32, #tpu.memory_space<vmem>>, vector<1x256xf32>
    %5 = vector.broadcast %4 : vector<1x256xf32> to vector<8x256xf32>
    %6 = arith.addf %3, %5 : vector<8x256xf32>
    %cst_5 = arith.constant 0.000000e+00 : f32
    %7 = vector.broadcast %cst_5 : f32 to vector<8x256xf32>
    %8 = arith.maximumf %6, %7 : vector<8x256xf32>
    %9 = arith.truncf %8 : vector<8x256xf32> to vector<8x256xbf16>
    %c0_6 = arith.constant 0 : index
    %c0_7 = arith.constant 0 : index
    %10 = vector.load %arg4[%c0_6, %c0_7] : memref<256x128xbf16, #tpu.memory_space<vmem>>, vector<256x128xbf16>
    %cst_8 = arith.constant dense<0.000000e+00> : vector<8x128xf32>
    %11 = tpu.matmul %9, %10, %cst_8 {dimension_numbers = #tpu.dot_dimension_numbers<[1], [0], [0], [1], [0, 0, 1, 1], [], []>} : vector<8x256xbf16>, vector<256x128xbf16>, vector<8x128xf32> -> vector<8x128xf32>
    %c0_9 = arith.constant 0 : index
    %c0_10 = arith.constant 0 : index
    %12 = vector.load %arg5[%c0_9, %c0_10] : memref<1x128xf32, #tpu.memory_space<vmem>>, vector<1x128xf32>
    %13 = vector.broadcast %12 : vector<1x128xf32> to vector<8x128xf32>
    %14 = arith.addf %11, %13 : vector<8x128xf32>
    %cst_11 = arith.constant 0.000000e+00 : f32
    %15 = vector.broadcast %cst_11 : f32 to vector<8x128xf32>
    %16 = arith.maximumf %14, %15 : vector<8x128xf32>
    %17 = arith.truncf %16 : vector<8x128xf32> to vector<8x128xbf16>
    %c0_12 = arith.constant 0 : index
    %c0_13 = arith.constant 0 : index
    %18 = vector.load %arg6[%c0_12, %c0_13] : memref<128x128xbf16, #tpu.memory_space<vmem>>, vector<128x128xbf16>
    %cst_14 = arith.constant dense<0.000000e+00> : vector<8x128xf32>
    %19 = tpu.matmul %17, %18, %cst_14 {dimension_numbers = #tpu.dot_dimension_numbers<[1], [0], [0], [1], [0, 0, 1, 1], [], []>} : vector<8x128xbf16>, vector<128x128xbf16>, vector<8x128xf32> -> vector<8x128xf32>
    %c0_15 = arith.constant 0 : index
    %c0_16 = arith.constant 0 : index
    %20 = vector.load %arg7[%c0_15, %c0_16] : memref<1x128xf32, #tpu.memory_space<vmem>>, vector<1x128xf32>
    %21 = vector.broadcast %20 : vector<1x128xf32> to vector<8x128xf32>
    %22 = arith.addf %19, %21 : vector<8x128xf32>
    %cst_17 = arith.constant 0.000000e+00 : f32
    %23 = vector.broadcast %cst_17 : f32 to vector<8x128xf32>
    %24 = arith.maximumf %22, %23 : vector<8x128xf32>
    %25 = arith.truncf %24 : vector<8x128xf32> to vector<8x128xbf16>
    %c0_18 = arith.constant 0 : index
    %c0_19 = arith.constant 0 : index
    %26 = vector.load %arg8[%c0_18, %c0_19] : memref<128x128xbf16, #tpu.memory_space<vmem>>, vector<128x128xbf16>
    %cst_20 = arith.constant dense<0.000000e+00> : vector<8x128xf32>
    %27 = tpu.matmul %25, %26, %cst_20 {dimension_numbers = #tpu.dot_dimension_numbers<[1], [0], [0], [1], [0, 0, 1, 1], [], []>} : vector<8x128xbf16>, vector<128x128xbf16>, vector<8x128xf32> -> vector<8x128xf32>
    %c0_21 = arith.constant 0 : index
    %c0_22 = arith.constant 0 : index
    %28 = vector.load %arg9[%c0_21, %c0_22] : memref<1x128xf32, #tpu.memory_space<vmem>>, vector<1x128xf32>
    %29 = vector.broadcast %28 : vector<1x128xf32> to vector<8x128xf32>
    %30 = arith.addf %27, %29 : vector<8x128xf32>
    %c0_23 = arith.constant 0 : index
    %c0_24 = arith.constant 0 : index
    %31 = vector.load %arg10[%c0_23, %c0_24] : memref<8x128xf32, #tpu.memory_space<vmem>>, vector<8x128xf32>
    tpu.vector_store %arg10[%c0_23, %c0_24], %30 {strides = array<i32>} : memref<8x128xf32, #tpu.memory_space<vmem>>, vector<8x128xf32>,
    return
  }
  func.func @transform_0(%arg0: i32) -> (i32, i32) {
    %c0_i32 = arith.constant 0 : i32
    %c0_i32_0 = arith.constant 0 : i32
    return %arg0, %c0_i32 : i32, i32
  }
  func.func @transform_1(%arg0: i32) -> (i32, i32) {
    %c0_i32 = arith.constant 0 : i32
    %c0_i32_0 = arith.constant 0 : i32
    %c0_i32_1 = arith.constant 0 : i32
    return %c0_i32, %c0_i32_0 : i32, i32
  }
  func.func @transform_2(%arg0: i32) -> (i32, i32) {
    %c0_i32 = arith.constant 0 : i32
    %c0_i32_0 = arith.constant 0 : i32
    %c0_i32_1 = arith.constant 0 : i32
    return %c0_i32, %c0_i32_0 : i32, i32
  }
  func.func @transform_3(%arg0: i32) -> (i32, i32) {
    %c0_i32 = arith.constant 0 : i32
    %c0_i32_0 = arith.constant 0 : i32
    %c0_i32_1 = arith.constant 0 : i32
    return %c0_i32, %c0_i32_0 : i32, i32
  }
  func.func @transform_4(%arg0: i32) -> (i32, i32) {
    %c0_i32 = arith.constant 0 : i32
    %c0_i32_0 = arith.constant 0 : i32
    %c0_i32_1 = arith.constant 0 : i32
    return %c0_i32, %c0_i32_0 : i32, i32
  }
  func.func @transform_5(%arg0: i32) -> (i32, i32) {
    %c0_i32 = arith.constant 0 : i32
    %c0_i32_0 = arith.constant 0 : i32
    %c0_i32_1 = arith.constant 0 : i32
    return %c0_i32, %c0_i32_0 : i32, i32
  }
  func.func @transform_6(%arg0: i32) -> (i32, i32) {
    %c0_i32 = arith.constant 0 : i32
    %c0_i32_0 = arith.constant 0 : i32
    %c0_i32_1 = arith.constant 0 : i32
    return %c0_i32, %c0_i32_0 : i32, i32
  }
  func.func @transform_7(%arg0: i32) -> (i32, i32) {
    %c0_i32 = arith.constant 0 : i32
    %c0_i32_0 = arith.constant 0 : i32
    %c0_i32_1 = arith.constant 0 : i32
    return %c0_i32, %c0_i32_0 : i32, i32
  }
  func.func @transform_8(%arg0: i32) -> (i32, i32) {
    %c0_i32 = arith.constant 0 : i32
    %c0_i32_0 = arith.constant 0 : i32
    %c0_i32_1 = arith.constant 0 : i32
    return %c0_i32, %c0_i32_0 : i32, i32
  }
  func.func @transform_9(%arg0: i32) -> (i32, i32) {
    %c0_i32 = arith.constant 0 : i32
    %c0_i32_0 = arith.constant 0 : i32
    return %arg0, %c0_i32 : i32, i32
  }
}

</mosaic_0001>

<bundles_post_ra>
// kernel: improved_mlp_forward.1
= control target key start
LH: loop header
LB: loop body
LE: loop exit
PB: predicated region body
PF: predicated region fallthrough
CT: control target
= control target key end

     0   :  { %14 = vsyncpa [#allocation3], 0  ;;  %s2179_s0 = inlined_call_operand.vmem [shape: f32[8,1024], index: 0, kind: input, shape index: {}]   ;;  %s2180_s1 = inlined_call_operand.hbm [shape: bf16[1024,256], index: 1, kind: input, shape index: {}]   ;;  %s2181_s2 = inlined_call_operand.vmem [shape: f32[1,256], index: 2, kind: input, shape index: {}]   ;;  %s2182_s3 = inlined_call_operand.vmem [shape: bf16[256,128], index: 3, kind: input, shape index: {}]   ;;  %s2183_s4 = inlined_call_operand.vmem [shape: f32[1,128], index: 4, kind: input, shape index: {}]   ;;  %s2184_s5 = inlined_call_operand.vmem [shape: bf16[128,128], index: 5, kind: input, shape index: {}]   ;;  %s2185_s6 = inlined_call_operand.vmem [shape: f32[1,128], index: 6, kind: input, shape index: {}]   ;;  %s2186_s7 = inlined_call_operand.hbm [shape: bf16[128,128], index: 7, kind: input, shape index: {}]   ;;  %s2187_s8 = inlined_call_operand.vmem [shape: f32[1,128], index: 8, kind: input, shape index: {}]   ;;  %s2188_s9 = inlined_call_operand.vmem [shape: f32[8,128], index: 9, kind: output, shape index: {}]  }
   0x1   :  { %15 = vsyncpa [#allocation5], 0  ;;  %s1968_s30 = smov [#allocation2]   ;;  %s1920_s13 = scalar_lea.hbm %s2180_s1, 16384 }
   0x2   :  { %s23_s10 = sshll.u32 %s1968_s30, 4  ;;  %p1921_p0 = scmp.ne.s32.totalorder %s2180_s1, %s1920_s13  ;;  %s24_s10 = int_to_ptr.vmem [resolvable:$true] %s23_s10 }
   0x3   :  { %p1924_p1 = scmp.lt.u32.totalorder %s1920_s13, %s2180_s1 }
   0x5   :  { %p1926_p2 = pnand %p1924_p1, %p1921_p0 }
   0x7   :  { %1929 = shalt.err (!%p1926_p2)
}
   0x8   :  { %s1930_s18 = scalar_lea.vmem %s24_s10, 16384  ;;  %p1935_p4 = scmp.lt.s32.totalorder %s24_s10, %s24_s10 }
   0x9   :  { %p1931_p3 = scmp.ne.s32.totalorder %s24_s10, %s1930_s18  ;;  %p1936_p5 = scmp.lt.s32.totalorder %s1930_s18, %s1930_s18 }
   0xb   :  { %p1937_p6 = por %p1936_p5, %p1935_p4 }
   0xd   :  { %p1938_p7 = pnand %p1937_p6, %p1931_p3 }
   0xf   :  { %1941 = shalt.err (!%p1938_p7)
}
  0x10   :  { %s1969_s19 = smov 128   ;;  %s1970_s20 = smov 8  }
  0x11   :  { %29 = dma.hbm_to_vmem [thread:$0]  %s2180_s1, 16384, %s24_s10, [#allocation3], %s1969_s19, %s1969_s19, %s1970_s20  }
  0x12   :  { %s1971_s23 = smov [#allocation4]   ;;  %s1942_s27 = scalar_lea.hbm %s2186_s7, 1024 }
  0x13   :  { %s45_s24 = sshll.u32 %s1971_s23, 4  ;;  %p1943_p8 = scmp.ne.s32.totalorder %s2186_s7, %s1942_s27  ;;  %s46_s24 = int_to_ptr.vmem [resolvable:$true] %s45_s24 }
  0x14   :  { %p1946_p9 = scmp.lt.u32.totalorder %s1942_s27, %s2186_s7 }
  0x16   :  { %p1948_p10 = pnand %p1946_p9, %p1943_p8 }
  0x18   :  { %1951 = shalt.err (!%p1948_p10)
}
  0x19   :  { %s1952_s12 = scalar_lea.vmem %s46_s24, 1024  ;;  %p1957_p12 = scmp.lt.s32.totalorder %s46_s24, %s46_s24 }
  0x1a   :  { %p1953_p11 = scmp.ne.s32.totalorder %s46_s24, %s1952_s12  ;;  %p1958_p13 = scmp.lt.s32.totalorder %s1952_s12, %s1952_s12 }
  0x1c   :  { %p1959_p0 = por %p1958_p13, %p1957_p12 }
  0x1e   :  { %p1960_p1 = pnand %p1959_p0, %p1953_p11 }
  0x20   :  { %1963 = shalt.err (!%p1960_p1)
}
  0x21   :  { %s1972_s1 = smov 64   ;;  %s1973_s10 = smov 4  }
  0x22   :  { %51 = dma.hbm_to_vmem [thread:$0]  %s2186_s7, 1024, %s46_s24, [#allocation5], %s1972_s1, %s1972_s1, %s1973_s10  }
  0x23   :  { %1964 = dma.done.wait [#allocation3], 16384  }
  0x24   :  { %1965 = vsyncadd [#allocation3], 4294950912 }
  0x25   :  { %1966 = dma.done.wait [#allocation5], 1024  }
  0x26   :  { %1967 = vsyncadd [#allocation5], 4294966272  ;;  %v1696_v0 = vld [vmem:[#allocation2 + $0x104] ss:$8 sps:$4 sm:$0xff]   ;;  %v1698_v1 = vld [vmem:[#allocation2 + $0x100] ss:$8 sps:$4 sm:$0xff]  }
  0x27   :  { %898 = vmatprep.subr.bf16.mxu0 %v1696_v0  ;;  %v1699_v2 = vld [vmem:[#allocation2 + $0x114] ss:$8 sps:$4 sm:$0xff]   ;;  %v1701_v3 = vld [vmem:[#allocation2 + $0x110] ss:$8 sps:$4 sm:$0xff]   ;;  %v1702_v4 = vld [vmem:[#allocation2 + $0x124] ss:$8 sps:$4 sm:$0xff]  }
  0x28   :  { %899 = vmatpush1.bf16.msra.mxu0 %v1698_v1  ;;  %v1704_v5 = vld [vmem:[#allocation2 + $0x120] ss:$8 sps:$4 sm:$0xff]   ;;  %v1705_v6 = vld [vmem:[#allocation2 + $0x134] ss:$8 sps:$4 sm:$0xff]   ;;  %v1707_v7 = vld [vmem:[#allocation2 + $0x130] ss:$8 sps:$4 sm:$0xff]  }
  0x29   :  { %900 = vmatprep.subr.bf16.mxu0 %v1699_v2  ;;  %v1708_v8 = vld [vmem:[#allocation2 + $0x144] ss:$8 sps:$4 sm:$0xff]   ;;  %v1710_v9 = vld [vmem:[#allocation2 + $0x140] ss:$8 sps:$4 sm:$0xff]   ;;  %v1711_v10 = vld [vmem:[#allocation2 + $0x154] ss:$8 sps:$4 sm:$0xff]  }
  0x2a   :  { %v1713_v11 = vld [vmem:[#allocation2 + $0x150] ss:$8 sps:$4 sm:$0xff]   ;;  %v1714_v12 = vld [vmem:[#allocation2 + $0x164] ss:$8 sps:$4 sm:$0xff]   ;;  %v1716_v15 = vld [vmem:[#allocation2 + $0x160] ss:$8 sps:$4 sm:$0xff]  }
  0x2b   :  { %v64_v13 = vld [vmem:[%s2179_s0 + $0x18] sm:$0xff]  ;;  %v1720_v18 = vld [vmem:[#allocation2 + $0x184] ss:$8 sps:$4 sm:$0xff]   ;;  %v1722_v19 = vld [vmem:[#allocation2 + $0x180] ss:$8 sps:$4 sm:$0xff]   ;;  %vm1975_vm0 = vmmov 0  }
  0x2c   :  { %901 = vmatpush1.bf16.msra.mxu0 %v1701_v3  ;;  %v72_v14 = vpack.c.bf16 %v64_v13, %v64_v13  ;;  %v1717_v16 = vld [vmem:[#allocation2 + $0x174] ss:$8 sps:$4 sm:$0xff]   ;;  %v1719_v17 = vld [vmem:[#allocation2 + $0x170] ss:$8 sps:$4 sm:$0xff]   ;;  %v1726_v22 = vld [vmem:[#allocation2 + $0x1a4] ss:$8 sps:$4 sm:$0xff]  }
  0x2d   :  { %902 = vmatprep.subr.bf16.mxu0 %v1702_v4  ;;  %v1723_v20 = vld [vmem:[#allocation2 + $0x194] ss:$8 sps:$4 sm:$0xff]   ;;  %v1725_v21 = vld [vmem:[#allocation2 + $0x190] ss:$8 sps:$4 sm:$0xff]   ;;  %v1728_v23 = vld [vmem:[#allocation2 + $0x1a0] ss:$8 sps:$4 sm:$0xff]  }
  0x2e   :  { %930 = vmatprep.mubr.bf16.mxu0 %v72_v14  ;;  %v1729_v24 = vld [vmem:[#allocation2 + $0x1b4] ss:$8 sps:$4 sm:$0xff]   ;;  %v1731_v25 = vld [vmem:[#allocation2 + $0x1b0] ss:$8 sps:$4 sm:$0xff]   ;;  %v1789_v26 = vld [vmem:[#allocation2 + $0x4] ss:$8 sps:$4 sm:$0xff]  }
  0x2f   :  { %v1791_v27 = vld [vmem:[#allocation2] ss:$8 sps:$4 sm:$0xff]   ;;  %v1732_v28 = vld [vmem:[#allocation2 + $0x1c4] ss:$8 sps:$4 sm:$0xff]   ;;  %857 = vmatprep.subr.bf16.mxu1 %v1789_v26  ;;  %v1795_v29 = vld [vmem:[#allocation2 + $0x14] ss:$8 sps:$4 sm:$0xff]  }
  0x30   :  { %903 = vmatpush1.bf16.msra.mxu0 %v1704_v5  ;;  %858 = vmatpush1.bf16.msra.mxu1 %v1791_v27  ;;  %v1797_v30 = vld [vmem:[#allocation2 + $0x10] ss:$8 sps:$4 sm:$0xff]   ;;  %v1734_v31 = vld [vmem:[#allocation2 + $0x1c0] ss:$8 sps:$4 sm:$0xff]   ;;  %v1735_v32 = vld [vmem:[#allocation2 + $0x1d4] ss:$8 sps:$4 sm:$0xff]  }
  0x31   :  { %904 = vmatprep.subr.bf16.mxu0 %v1705_v6  ;;  %859 = vmatprep.subr.bf16.mxu1 %v1795_v29  ;;  %v1801_v33 = vld [vmem:[#allocation2 + $0x24] ss:$8 sps:$4 sm:$0xff]   ;;  %v1803_v34 = vld [vmem:[#allocation2 + $0x20] ss:$8 sps:$4 sm:$0xff]   ;;  %v1737_v35 = vld [vmem:[#allocation2 + $0x1d0] ss:$8 sps:$4 sm:$0xff]  }
  0x32   :  { %v1807_v36 = vld [vmem:[#allocation2 + $0x34] ss:$8 sps:$4 sm:$0xff]   ;;  %v1738_v37 = vld [vmem:[#allocation2 + $0x1e4] ss:$8 sps:$4 sm:$0xff]   ;;  %v1809_v38 = vld [vmem:[#allocation2 + $0x30] ss:$8 sps:$4 sm:$0xff]  }
  0x33   :  { %v1813_v39 = vld [vmem:[#allocation2 + $0x44] ss:$8 sps:$4 sm:$0xff]   ;;  %v1740_v40 = vld [vmem:[#allocation2 + $0x1e0] ss:$8 sps:$4 sm:$0xff]   ;;  %v1741_v41 = vld [vmem:[#allocation2 + $0x1f4] ss:$8 sps:$4 sm:$0xff]  }
  0x34   :  { %905 = vmatpush1.bf16.msra.mxu0 %v1707_v7  ;;  %860 = vmatpush1.bf16.msra.mxu1 %v1797_v30  ;;  %v1815_v42 = vld [vmem:[#allocation2 + $0x40] ss:$8 sps:$4 sm:$0xff]   ;;  %v1743_v43 = vld [vmem:[#allocation2 + $0x1f0] ss:$8 sps:$4 sm:$0xff]   ;;  %v1819_v44 = vld [vmem:[#allocation2 + $0x54] ss:$8 sps:$4 sm:$0xff]  }
  0x35   :  { %906 = vmatprep.subr.bf16.mxu0 %v1708_v8  ;;  %861 = vmatprep.subr.bf16.mxu1 %v1801_v33  ;;  %v1746_v45 = vld [vmem:[#allocation2 + $0x204] ss:$8 sps:$4 sm:$0xff]   ;;  %v63_v46 = vld [vmem:[%s2179_s0 + $0x10] sm:$0xff]  ;;  %v1744_v51 = vld [vmem:[#allocation2 + $0x200] ss:$8 sps:$4 sm:$0xff]  }
  0x36   :  { %v66_v47 = vld [vmem:[%s2179_s0 + $0x28] sm:$0xff]  ;;  %v1821_v48 = vld [vmem:[#allocation2 + $0x50] ss:$8 sps:$4 sm:$0xff]   ;;  %v71_v49 = vpack.c.bf16 %v63_v46, %v63_v46  ;;  %v1749_v53 = vld [vmem:[#allocation2 + $0x214] ss:$8 sps:$4 sm:$0xff]  }
  0x37   :  { %v1825_v50 = vld [vmem:[#allocation2 + $0x64] ss:$8 sps:$4 sm:$0xff]   ;;  %v74_v52 = vpack.c.bf16 %v66_v47, %v66_v47  ;;  %v1827_v54 = vld [vmem:[#allocation2 + $0x60] ss:$8 sps:$4 sm:$0xff]   ;;  %v1831_v55 = vld [vmem:[#allocation2 + $0x74] ss:$8 sps:$4 sm:$0xff]  }
  0x38   :  { %907 = vmatpush1.bf16.msra.mxu0 %v1710_v9  ;;  %862 = vmatpush1.bf16.msra.mxu1 %v1803_v34  ;;  %v1747_v56 = vld [vmem:[#allocation2 + $0x210] ss:$8 sps:$4 sm:$0xff]   ;;  %v1752_v57 = vld [vmem:[#allocation2 + $0x224] ss:$8 sps:$4 sm:$0xff]   ;;  %v1750_v60 = vld [vmem:[#allocation2 + $0x220] ss:$8 sps:$4 sm:$0xff]  }
  0x39   :  { %908 = vmatprep.subr.bf16.mxu0 %v1711_v10  ;;  %863 = vmatprep.subr.bf16.mxu1 %v1807_v36  ;;  %v1833_v58 = vld [vmem:[#allocation2 + $0x70] ss:$8 sps:$4 sm:$0xff]   ;;  %v1837_v59 = vld [vmem:[#allocation2 + $0x84] ss:$8 sps:$4 sm:$0xff]   ;;  %v1755_v61 = vld [vmem:[#allocation2 + $0x234] ss:$8 sps:$4 sm:$0xff]  }
  0x3a   :  { %v1839_v62 = vld [vmem:[#allocation2 + $0x80] ss:$8 sps:$4 sm:$0xff]   ;;  %v1843_v63 = vld [vmem:[#allocation2 + $0x94] ss:$8 sps:$4 sm:$0xff]   ;;  %v1753_v0 = vld [vmem:[#allocation2 + $0x230] ss:$8 sps:$4 sm:$0xff]  }
  0x3b   :  { %v1758_v1 = vld [vmem:[#allocation2 + $0x244] ss:$8 sps:$4 sm:$0xff]   ;;  %v1845_v2 = vld [vmem:[#allocation2 + $0x90] ss:$8 sps:$4 sm:$0xff]   ;;  %v1756_v4 = vld [vmem:[#allocation2 + $0x240] ss:$8 sps:$4 sm:$0xff]  }
  0x3c   :  { %909 = vmatpush1.bf16.msra.mxu0 %v1713_v11  ;;  %864 = vmatpush1.bf16.msra.mxu1 %v1809_v38  ;;  %v1849_v3 = vld [vmem:[#allocation2 + $0xa4] ss:$8 sps:$4 sm:$0xff]   ;;  %v1761_v5 = vld [vmem:[#allocation2 + $0x254] ss:$8 sps:$4 sm:$0xff]   ;;  %v1851_v6 = vld [vmem:[#allocation2 + $0xa0] ss:$8 sps:$4 sm:$0xff]  }
  0x3d   :  { %910 = vmatprep.subr.bf16.mxu0 %v1714_v12  ;;  %865 = vmatprep.subr.bf16.mxu1 %v1813_v39  ;;  %v1855_v7 = vld [vmem:[#allocation2 + $0xb4] ss:$8 sps:$4 sm:$0xff]   ;;  %v1759_v8 = vld [vmem:[#allocation2 + $0x250] ss:$8 sps:$4 sm:$0xff]   ;;  %v1764_v9 = vld [vmem:[#allocation2 + $0x264] ss:$8 sps:$4 sm:$0xff]  }
  0x3e   :  { %v1857_v10 = vld [vmem:[#allocation2 + $0xb0] ss:$8 sps:$4 sm:$0xff]   ;;  %v62_v11 = vld [vmem:[%s2179_s0 + $0x8] sm:$0xff]  ;;  %v1879_v27 = vld [vmem:[#allocation2 + $0xf4] ss:$8 sps:$4 sm:$0xff]  }
  0x3f   :  { %v1861_v12 = vld [vmem:[#allocation2 + $0xc4] ss:$8 sps:$4 sm:$0xff]   ;;  %v70_v13 = vpack.c.bf16 %v62_v11, %v62_v11  ;;  %v1762_v14 = vld [vmem:[#allocation2 + $0x260] ss:$8 sps:$4 sm:$0xff]   ;;  %v1777_v36 = vld [vmem:[#allocation2 + $0x2b0] ss:$8 sps:$4 sm:$0xff]  }
  0x40   :  { %911 = vmatpush1.bf16.msra.mxu0 %v1716_v15  ;;  %866 = vmatpush1.bf16.msra.mxu1 %v1815_v42  ;;  %v1767_v15 = vld [vmem:[#allocation2 + $0x274] ss:$8 sps:$4 sm:$0xff]   ;;  %v1776_v26 = vld [vmem:[#allocation2 + $0x2a4] ss:$8 sps:$4 sm:$0xff]   ;;  %v1852_v11 = vld [vmem:[#allocation2 + $0x390] ss:$8 sps:$4 sm:$0xff]  }
  0x41   :  { %912 = vmatprep.subr.bf16.mxu0 %v1717_v16  ;;  %867 = vmatprep.subr.bf16.mxu1 %v1819_v44  ;;  %v1863_v16 = vld [vmem:[#allocation2 + $0xc0] ss:$8 sps:$4 sm:$0xff]   ;;  %v1892_v39 = vld [vmem:[%s2182_s3 + $0x50] sm:$0xff]   ;;  %v1895_v46 = vld [vmem:[%s2182_s3 + $0x18] sm:$0xff]  }
  0x42   :  { %889 = vmatprep.mubr.bf16.mxu1 %v70_v13  ;;  %v61_v29 = vld [vmem:[%s2179_s0] sm:$0xff]  ;;  %v1891_v38 = vld [vmem:[%s2182_s3 + $0x8] sm:$0xff]   ;;  %v1893_v42 = vld [vmem:[%s2182_s3 + $0x10] sm:$0xff]  }
  0x43   :  { %v1888_v30 = vld [vmem:[%s2182_s3 + $0x40] sm:$0xff]   ;;  %v69_v34 = vpack.c.bf16 %v61_v29, %v61_v29  ;;  %v1783_v44 = vld [vmem:[#allocation2 + $0x2d0] ss:$8 sps:$4 sm:$0xff]  }
  0x44   :  { %913 = vmatpush1.bf16.msra.mxu0 %v1719_v17  ;;  %868 = vmatpush1.bf16.msra.mxu1 %v1821_v48  ;;  %v1867_v17 = vld [vmem:[#allocation2 + $0xd4] ss:$8 sps:$4 sm:$0xff]   ;;  %v1889_v33 = vld [vmem:[%s2182_s3] sm:$0xff]  }
  0x45   :  { %914 = vmatprep.subr.bf16.mxu0 %v1720_v18  ;;  %869 = vmatprep.subr.bf16.mxu1 %v1825_v50  ;;  %v1765_v18 = vld [vmem:[#allocation2 + $0x270] ss:$8 sps:$4 sm:$0xff]   ;;  %v1896_v47 = vld [vmem:[%s2182_s3 + $0x60] sm:$0xff]  }
  0x46   :  { %v1786_v48 = vld [vmem:[#allocation2 + $0x2e0] ss:$8 sps:$4 sm:$0xff]   ;;  %v1901_v29 = vld [vmem:[%s2182_s3 + $0x30] sm:$0xff]  }
  0x47   :  { %v1897_v50 = vld [vmem:[%s2182_s3 + $0x20] sm:$0xff]  }
  0x48   :  { %915 = vmatpush1.bf16.msra.mxu0 %v1722_v19  ;;  %870 = vmatpush1.bf16.msra.mxu1 %v1827_v54  ;;  %v1770_v19 = vld [vmem:[#allocation2 + $0x284] ss:$8 sps:$4 sm:$0xff]   ;;  %v68_v54 = vld [vmem:[%s2179_s0 + $0x38] sm:$0xff]  ;;  %v1858_v13 = vld [vmem:[#allocation2 + $0x3a0] ss:$8 sps:$4 sm:$0xff]  }
  0x49   :  { %916 = vmatprep.subr.bf16.mxu0 %v1723_v20  ;;  %871 = vmatprep.subr.bf16.mxu1 %v1831_v55  ;;  %v1869_v20 = vld [vmem:[#allocation2 + $0xd0] ss:$8 sps:$4 sm:$0xff]  }
  0x4c   :  { %917 = vmatpush1.bf16.msra.mxu0 %v1725_v21  ;;  %872 = vmatpush1.bf16.msra.mxu1 %v1833_v58  ;;  %v1873_v21 = vld [vmem:[#allocation2 + $0xe4] ss:$8 sps:$4 sm:$0xff]   ;;  %v1806_v58 = vld [vmem:[#allocation2 + $0x314] ss:$8 sps:$4 sm:$0xff]  }
  0x4d   :  { %918 = vmatprep.subr.bf16.mxu0 %v1726_v22  ;;  %873 = vmatprep.subr.bf16.mxu1 %v1837_v59  ;;  %v1768_v22 = vld [vmem:[#allocation2 + $0x280] ss:$8 sps:$4 sm:$0xff]   ;;  %v1804_v59 = vld [vmem:[#allocation2 + $0x310] ss:$8 sps:$4 sm:$0xff]  }
  0x50   :  { %919 = vmatpush1.bf16.msra.mxu0 %v1728_v23  ;;  %874 = vmatpush1.bf16.msra.mxu1 %v1839_v62  ;;  %v1773_v23 = vld [vmem:[#allocation2 + $0x294] ss:$8 sps:$4 sm:$0xff]  }
  0x51   :  { %920 = vmatprep.subr.bf16.mxu0 %v1729_v24  ;;  %875 = vmatprep.subr.bf16.mxu1 %v1843_v63  ;;  %v1771_v24 = vld [vmem:[#allocation2 + $0x290] ss:$8 sps:$4 sm:$0xff]   ;;  %v1818_v62 = vld [vmem:[#allocation2 + $0x334] ss:$8 sps:$4 sm:$0xff]  }
  0x52   :  { %v1816_v63 = vld [vmem:[#allocation2 + $0x330] ss:$8 sps:$4 sm:$0xff]  }
  0x54   :  { %921 = vmatpush1.bf16.msra.mxu0 %v1731_v25  ;;  %876 = vmatpush1.bf16.msra.mxu1 %v1845_v2  ;;  %v1875_v25 = vld [vmem:[#allocation2 + $0xe0] ss:$8 sps:$4 sm:$0xff]   ;;  %v1830_v2 = vld [vmem:[#allocation2 + $0x354] ss:$8 sps:$4 sm:$0xff]  }
  0x55   :  { %922 = vmatprep.subr.bf16.mxu0 %v1732_v28  ;;  %877 = vmatprep.subr.bf16.mxu1 %v1849_v3  ;;  %v1881_v28 = vld [vmem:[#allocation2 + $0xf0] ss:$8 sps:$4 sm:$0xff]  }
  0x56   :  { %v1828_v3 = vld [vmem:[#allocation2 + $0x350] ss:$8 sps:$4 sm:$0xff]  }
  0x58   :  { %923 = vmatpush1.bf16.msra.mxu0 %v1734_v31  ;;  %878 = vmatpush1.bf16.msra.mxu1 %v1851_v6  ;;  %v1774_v31 = vld [vmem:[#allocation2 + $0x2a0] ss:$8 sps:$4 sm:$0xff]   ;;  %v1842_v6 = vld [vmem:[#allocation2 + $0x374] ss:$8 sps:$4 sm:$0xff]  }
  0x59   :  { %924 = vmatprep.subr.bf16.mxu0 %v1735_v32  ;;  %879 = vmatprep.subr.bf16.mxu1 %v1855_v7  ;;  %v1779_v32 = vld [vmem:[#allocation2 + $0x2b4] ss:$8 sps:$4 sm:$0xff]   ;;  %v1840_v7 = vld [vmem:[#allocation2 + $0x370] ss:$8 sps:$4 sm:$0xff]  }
  0x5c   :  { %925 = vmatpush1.bf16.msra.mxu0 %v1737_v35  ;;  %880 = vmatpush1.bf16.msra.mxu1 %v1857_v10  ;;  %v1890_v35 = vld [vmem:[%s2182_s3 + $0x48] sm:$0xff]   ;;  %v1854_v10 = vld [vmem:[#allocation2 + $0x394] ss:$8 sps:$4 sm:$0xff]  }
  0x5d   :  { %926 = vmatprep.subr.bf16.mxu0 %v1738_v37  ;;  %881 = vmatprep.subr.bf16.mxu1 %v1861_v12  ;;  %v1782_v37 = vld [vmem:[#allocation2 + $0x2c4] ss:$8 sps:$4 sm:$0xff]  }
  0x5e   :  { %v1860_v12 = vld [vmem:[#allocation2 + $0x3a4] ss:$8 sps:$4 sm:$0xff]  }
  0x60   :  { %927 = vmatpush1.bf16.msra.mxu0 %v1740_v40  ;;  %882 = vmatpush1.bf16.msra.mxu1 %v1863_v16  ;;  %v1780_v40 = vld [vmem:[#allocation2 + $0x2c0] ss:$8 sps:$4 sm:$0xff]   ;;  %v1872_v16 = vld [vmem:[#allocation2 + $0x3c4] ss:$8 sps:$4 sm:$0xff]  }
  0x61   :  { %928 = vmatprep.subr.bf16.mxu0 %v1741_v41  ;;  %883 = vmatprep.subr.bf16.mxu1 %v1867_v17  ;;  %v1785_v41 = vld [vmem:[#allocation2 + $0x2d4] ss:$8 sps:$4 sm:$0xff]   ;;  %v1870_v17 = vld [vmem:[#allocation2 + $0x3c0] ss:$8 sps:$4 sm:$0xff]  }
  0x64   :  { %929 = vmatpush1.bf16.msra.mxu0 %v1743_v43  ;;  %884 = vmatpush1.bf16.msra.mxu1 %v1869_v20  ;;  %v1894_v43 = vld [vmem:[%s2182_s3 + $0x58] sm:$0xff]   ;;  %v1884_v20 = vld [vmem:[#allocation2 + $0x3e4] ss:$8 sps:$4 sm:$0xff]  }
  0x65   :  { %939 = vmatprep.subr.bf16.mxu0 %v1746_v45  ;;  %885 = vmatprep.subr.bf16.mxu1 %v1873_v21  ;;  %v1788_v45 = vld [vmem:[#allocation2 + $0x2e4] ss:$8 sps:$4 sm:$0xff]   ;;  %v1882_v21 = vld [vmem:[#allocation2 + $0x3e0] ss:$8 sps:$4 sm:$0xff]  }
  0x67   :  { %931 = vmatmul.mubr.bf16.vlgmr.msra.gmra.mrb[0].mxu0 %v71_v49  ;;  %v1794_v49 = vld [vmem:[#allocation2 + $0x2f4] ss:$8 sps:$4 sm:$0xff]  }
  0x68   :  { %940 = vmatpush1.bf16.msra.mxu0 %v1744_v51  ;;  %971 = vmatprep.mubr.bf16.mxu0 %v74_v52  ;;  %v1792_v51 = vld [vmem:[#allocation2 + $0x2f0] ss:$8 sps:$4 sm:$0xff]   ;;  %v65_v52 = vld [vmem:[%s2179_s0 + $0x20] sm:$0xff] }
  0x69   :  { %941 = vmatprep.subr.bf16.mxu0 %v1749_v53  ;;  %886 = vmatpush1.bf16.msra.mxu1 %v1875_v25  ;;  %v1800_v53 = vld [vmem:[#allocation2 + $0x304] ss:$8 sps:$4 sm:$0xff]   ;;  %v73_v55 = vpack.c.bf16 %v65_v52, %v65_v52 }
  0x6a   :  { %887 = vmatprep.subr.bf16.mxu1 %v1879_v27  ;;  %v1899_v27 = vld [vmem:[%s2182_s3 + $0x28] sm:$0xff]  }
  0x6c   :  { %942 = vmatpush1.bf16.msra.mxu0 %v1747_v56  ;;  %v1798_v56 = vld [vmem:[#allocation2 + $0x300] ss:$8 sps:$4 sm:$0xff]  }
  0x6d   :  { %943 = vmatprep.subr.bf16.mxu0 %v1752_v57  ;;  %888 = vmatpush1.bf16.msra.mxu1 %v1881_v28  ;;  %v76_v57 = vpack.c.bf16 %v68_v54, %v68_v54  ;;  %v1900_v28 = vld [vmem:[%s2182_s3 + $0x70] sm:$0xff]  }
  0x6e   :  { %1596 = vmatprep.subr.bf16.mxu1 %v1888_v30  ;;  %v1902_v30 = vld [vmem:[%s2182_s3 + $0x78] sm:$0xff]  }
  0x70   :  { %944 = vmatpush1.bf16.msra.mxu0 %v1750_v60  ;;  %890 = vmatmul.mubr.bf16.vlgmr.msra.gmra.mrb[0].mxu1 %v69_v34  ;;  %v1812_v60 = vld [vmem:[#allocation2 + $0x324] ss:$8 sps:$4 sm:$0xff]  }
  0x71   :  { %945 = vmatprep.subr.bf16.mxu0 %v1755_v61  ;;  %1597 = vmatpush3.bf16.msra.mxu1 %v1889_v33  ;;  %v1810_v61 = vld [vmem:[#allocation2 + $0x320] ss:$8 sps:$4 sm:$0xff]  }
  0x72   :  { %1598 = vmatprep.subr.bf16.mxu1 %v1890_v35 }
  0x74   :  { %946 = vmatpush1.bf16.msra.mxu0 %v1753_v0  ;;  %v1824_v0 = vld [vmem:[#allocation2 + $0x344] ss:$8 sps:$4 sm:$0xff]  }
  0x75   :  { %947 = vmatprep.subr.bf16.mxu0 %v1758_v1  ;;  %1599 = vmatpush3.bf16.msra.mxu1 %v1891_v38  ;;  %v1822_v1 = vld [vmem:[#allocation2 + $0x340] ss:$8 sps:$4 sm:$0xff]  }
  0x76   :  { %1600 = vmatprep.subr.bf16.mxu1 %v1892_v39 }
  0x78   :  { %948 = vmatpush1.bf16.msra.mxu0 %v1756_v4  ;;  %v1836_v4 = vld [vmem:[#allocation2 + $0x364] ss:$8 sps:$4 sm:$0xff]  }
  0x79   :  { %949 = vmatprep.subr.bf16.mxu0 %v1761_v5  ;;  %1601 = vmatpush3.bf16.msra.mxu1 %v1893_v42  ;;  %v1834_v5 = vld [vmem:[#allocation2 + $0x360] ss:$8 sps:$4 sm:$0xff]  }
  0x7a   :  { %1602 = vmatprep.subr.bf16.mxu1 %v1894_v43 }
  0x7c   :  { %950 = vmatpush1.bf16.msra.mxu0 %v1759_v8  ;;  %v1848_v8 = vld [vmem:[#allocation2 + $0x384] ss:$8 sps:$4 sm:$0xff]  }
  0x7d   :  { %951 = vmatprep.subr.bf16.mxu0 %v1764_v9  ;;  %1603 = vmatpush3.bf16.msra.mxu1 %v1895_v46  ;;  %v1846_v9 = vld [vmem:[#allocation2 + $0x380] ss:$8 sps:$4 sm:$0xff]  }
  0x7e   :  { %1604 = vmatprep.subr.bf16.mxu1 %v1896_v47 }
  0x80   :  { %952 = vmatpush1.bf16.msra.mxu0 %v1762_v14  ;;  %v1866_v14 = vld [vmem:[#allocation2 + $0x3b4] ss:$8 sps:$4 sm:$0xff]  }
  0x81   :  { %953 = vmatprep.subr.bf16.mxu0 %v1767_v15  ;;  %1605 = vmatpush3.bf16.msra.mxu1 %v1897_v50  ;;  %v1864_v15 = vld [vmem:[#allocation2 + $0x3b0] ss:$8 sps:$4 sm:$0xff]  }
  0x84   :  { %954 = vmatpush1.bf16.msra.mxu0 %v1765_v18  ;;  %v1878_v18 = vld [vmem:[#allocation2 + $0x3d4] ss:$8 sps:$4 sm:$0xff]  }
  0x85   :  { %955 = vmatprep.subr.bf16.mxu0 %v1770_v19  ;;  %v1876_v19 = vld [vmem:[#allocation2 + $0x3d0] ss:$8 sps:$4 sm:$0xff]  }
  0x88   :  { %956 = vmatpush1.bf16.msra.mxu0 %v1768_v22  ;;  %v1887_v22 = vld [vmem:[#allocation2 + $0x3f4] ss:$8 sps:$4 sm:$0xff]  }
  0x89   :  { %957 = vmatprep.subr.bf16.mxu0 %v1773_v23  ;;  %v1885_v23 = vld [vmem:[#allocation2 + $0x3f0] ss:$8 sps:$4 sm:$0xff]  }
  0x8c   :  { %958 = vmatpush1.bf16.msra.mxu0 %v1771_v24  ;;  %v67_v24 = vld [vmem:[%s2179_s0 + $0x30] sm:$0xff] }
  0x8d   :  { %959 = vmatprep.subr.bf16.mxu0 %v1776_v26  ;;  %v75_v25 = vpack.c.bf16 %v67_v24, %v67_v24  ;;  %v1898_v26 = vld [vmem:[%s2182_s3 + $0x68] sm:$0xff]  }
  0x8e   :  { %1606 = vmatprep.subr.bf16.mxu1 %v1898_v26 }
  0x8f   :  { %1607 = vmatpush3.bf16.msra.mxu1 %v1899_v27 }
  0x90   :  { %960 = vmatpush1.bf16.msra.mxu0 %v1774_v31  ;;  %1608 = vmatprep.subr.bf16.mxu1 %v1900_v28  ;;  %v1903_v31 = vld [vmem:[%s2182_s3 + $0x38] sm:$0xff]  }
  0x91   :  { %961 = vmatprep.subr.bf16.mxu0 %v1779_v32  ;;  %v1974_v32 = vmov 0.0  }
  0x93   :  { %1609 = vmatpush3.bf16.msra.mxu1 %v1901_v29 }
  0x94   :  { %962 = vmatpush1.bf16.msra.mxu0 %v1777_v36  ;;  %1610 = vmatprep.subr.bf16.mxu1 %v1902_v30 }
  0x95   :  { %963 = vmatprep.subr.bf16.mxu0 %v1782_v37  ;;  %v207_v37 = vlaneseq }
  0x97   :  { %1611 = vmatpush3.bf16.msra.mxu1 %v1903_v31  ;;  %v208_v38 = vshrl.u32 %v207_v37, 7 }
  0x98   :  { %964 = vmatpush1.bf16.msra.mxu0 %v1780_v40  ;;  %1636 = vmatprep.subr.bf16.mxu1 %v1974_v32  ;;  %v205_v40 = vld [vmem:[%s2181_s2] sm:$0x3] }
  0x99   :  { %965 = vmatprep.subr.bf16.mxu0 %v1785_v41  ;;  %v209_v39 = vsub.s32 0, %v208_v38  ;;  %v213_v41 = vsub.s32 1, %v208_v38 }
  0x9b   :  { %v210_v42 = vrot.slane %v205_v40, %v209_v39  ;;  %v214_v43 = vrot.slane %v205_v40, %v213_v41 }
  0x9c   :  { %966 = vmatpush1.bf16.msra.mxu0 %v1783_v44 }
  0x9d   :  { %967 = vmatprep.subr.bf16.mxu0 %v1788_v45 }
  0xa0   :  { %968 = vmatpush1.bf16.msra.mxu0 %v1786_v48 }
  0xa1   :  { %969 = vmatprep.subr.bf16.mxu0 %v1794_v49 }
  0xa4   :  { %970 = vmatpush1.bf16.msra.mxu0 %v1792_v51 }
  0xa5   :  { %980 = vmatprep.subr.bf16.mxu0 %v1800_v53 }
  0xa7   :  { %972 = vmatmul.mubr.bf16.vlgmr.msra.gmra.mrb[0].mxu0 %v73_v55  ;;  %v1904_v55 = vld [vmem:[%s2184_s5] sm:$0xff]  }
  0xa8   :  { %981 = vmatpush1.bf16.msra.mxu0 %v1798_v56  ;;  %1012 = vmatprep.mubr.bf16.mxu0 %v76_v57  ;;  %v1905_v57 = vld [vmem:[%s2184_s5 + $0x8] sm:$0xff]  }
  0xa9   :  { %982 = vmatprep.subr.bf16.mxu0 %v1806_v58  ;;  %v1906_v58 = vld [vmem:[%s2184_s5 + $0x10] sm:$0xff]  }
  0xac   :  { %983 = vmatpush1.bf16.msra.mxu0 %v1804_v59  ;;  %v1907_v59 = vld [vmem:[%s2184_s5 + $0x18] sm:$0xff]  }
  0xad   :  { %984 = vmatprep.subr.bf16.mxu0 %v1812_v60  ;;  %v1908_v60 = vld [vmem:[%s2184_s5 + $0x20] sm:$0xff]  }
  0xb0   :  { %985 = vmatpush1.bf16.msra.mxu0 %v1810_v61  ;;  %v1909_v61 = vld [vmem:[%s2184_s5 + $0x28] sm:$0xff]  }
  0xb1   :  { %986 = vmatprep.subr.bf16.mxu0 %v1818_v62  ;;  %v1910_v62 = vld [vmem:[%s2184_s5 + $0x30] sm:$0xff]  }
  0xb4   :  { %987 = vmatpush1.bf16.msra.mxu0 %v1816_v63  ;;  %v1911_v63 = vld [vmem:[%s2184_s5 + $0x38] sm:$0xff]  }
  0xb5   :  { %988 = vmatprep.subr.bf16.mxu0 %v1824_v0 }
  0xb8   :  { %989 = vmatpush1.bf16.msra.mxu0 %v1822_v1  ;;  %v1561_v1 = vld [vmem:[%s2183_s4] ss:$0 sm:$0xff] }
  0xb9   :  { %990 = vmatprep.subr.bf16.mxu0 %v1830_v2 }
  0xbc   :  { %991 = vmatpush1.bf16.msra.mxu0 %v1828_v3 }
  0xbd   :  { %992 = vmatprep.subr.bf16.mxu0 %v1836_v4 }
  0xc0   :  { %993 = vmatpush1.bf16.msra.mxu0 %v1834_v5 }
  0xc1   :  { %994 = vmatprep.subr.bf16.mxu0 %v1842_v6 }
  0xc4   :  { %995 = vmatpush1.bf16.msra.mxu0 %v1840_v7 }
  0xc5   :  { %996 = vmatprep.subr.bf16.mxu0 %v1848_v8  ;;  %v1912_v8 = vld [vmem:[#allocation4] sm:$0xff]  }
  0xc8   :  { %997 = vmatpush1.bf16.msra.mxu0 %v1846_v9 }
  0xc9   :  { %998 = vmatprep.subr.bf16.mxu0 %v1854_v10  ;;  %v1913_v10 = vld [vmem:[#allocation4 + $0x8] sm:$0xff]  }
  0xcc   :  { %999 = vmatpush1.bf16.msra.mxu0 %v1852_v11  ;;  %v1914_v11 = vld [vmem:[#allocation4 + $0x10] sm:$0xff]  }
  0xcd   :  { %1000 = vmatprep.subr.bf16.mxu0 %v1860_v12  ;;  %v1915_v12 = vld [vmem:[#allocation4 + $0x18] sm:$0xff]  }
  0xd0   :  { %1001 = vmatpush1.bf16.msra.mxu0 %v1858_v13  ;;  %v1916_v13 = vld [vmem:[#allocation4 + $0x20] sm:$0xff]  }
  0xd1   :  { %1002 = vmatprep.subr.bf16.mxu0 %v1866_v14  ;;  %v1917_v14 = vld [vmem:[#allocation4 + $0x28] sm:$0xff]  }
  0xd4   :  { %1003 = vmatpush1.bf16.msra.mxu0 %v1864_v15  ;;  %v1918_v15 = vld [vmem:[#allocation4 + $0x30] sm:$0xff]  }
  0xd5   :  { %1004 = vmatprep.subr.bf16.mxu0 %v1872_v16  ;;  %v1919_v16 = vld [vmem:[#allocation4 + $0x38] sm:$0xff]  }
  0xd8   :  { %1005 = vmatpush1.bf16.msra.mxu0 %v1870_v17  ;;  %v1578_v17 = vld [vmem:[%s2185_s6] ss:$0 sm:$0xff] }
  0xd9   :  { %1006 = vmatprep.subr.bf16.mxu0 %v1878_v18 }
  0xdc   :  { %1007 = vmatpush1.bf16.msra.mxu0 %v1876_v19 }
  0xdd   :  { %1008 = vmatprep.subr.bf16.mxu0 %v1884_v20 }
  0xe0   :  { %1009 = vmatpush1.bf16.msra.mxu0 %v1882_v21 }
  0xe1   :  { %1010 = vmatprep.subr.bf16.mxu0 %v1887_v22 }
  0xe4   :  { %1011 = vmatpush1.bf16.msra.mxu0 %v1885_v23 }
  0xe7   :  { %1013 = vmatmul.mubr.bf16.vlgmr.msra.gmra.mrb[0].mxu0 %v75_v25  ;;  %v1587_v25 = vld [vmem:[%s2187_s8] ss:$0 sm:$0xff] }
 0x143   :  { %v891_v33 = vpop.f32.mrb[0].mxu1 }
 0x144   :  { %v893_v34 = vpop.f32.mrb[1].mxu1  ;;  %v892_v44 = vadd.f32 %v891_v33, %v210_v42 }
 0x145   :  { %v895_v35 = vpop.f32.mrb[2].mxu1  ;;  %v894_v45 = vadd.f32 %v893_v34, %v214_v43 }
 0x146   :  { %v896_v36 = vpop.f32.mrb[3].mxu1 }
 0x1ba   :  { %v1014_v46 = vpop.f32.mrb[0].mxu0 }
 0x1bb   :  { %v1677_v47 = vadd.f32 %v1014_v46, %v892_v44  ;;  %v1016_v48 = vpop.f32.mrb[1].mxu0 }
 0x1bc   :  { %v1679_v49 = vadd.f32 %v1016_v48, %v894_v45  ;;  %v1018_v50 = vpop.f32.mrb[2].mxu0 }
 0x1bd   :  { %v1021_v51 = vmax.f32 %v1677_v47, 0.0  ;;  %v1019_v52 = vpop.f32.mrb[3].mxu0 }
 0x1be   :  { %v1022_v53 = vmax.f32 %v1679_v49, 0.0 }
 0x1bf   :  { %v1023_v56 = vpack.c.bf16 %v1021_v51, %v1021_v51 }
 0x1c0   :  { %v1024_v54 = vpack.c.bf16 %v1022_v53, %v1022_v53 }
 0x1c2   :  { %1192 = vmatprep.mubr.bf16.mxu1 %v1024_v54 }
 0x1c3   :  { %1193 = vmatmul.mubr.bf16.vlgmr.msra.gmra.mrb[4].mxu1 %v1023_v56 }
 0x1c4   :  { %1637 = vmatpush3.bf16.msra.mxu1 %v1904_v55  ;;  %1652 = vmatprep.mubr.msk.bf16.mxu1 %vm1975_vm0, %v1974_v32 }
 0x1c5   :  { %1638 = vmatprep.subr.bf16.mxu1 %v1974_v32 }
 0x1c8   :  { %1639 = vmatpush3.bf16.msra.mxu1 %v1905_v57 }
 0x1c9   :  { %1640 = vmatprep.subr.bf16.mxu1 %v1974_v32 }
 0x1cc   :  { %1641 = vmatpush3.bf16.msra.mxu1 %v1906_v58 }
 0x1cd   :  { %1642 = vmatprep.subr.bf16.mxu1 %v1974_v32 }
 0x1d0   :  { %1643 = vmatpush3.bf16.msra.mxu1 %v1907_v59 }
 0x1d1   :  { %1644 = vmatprep.subr.bf16.mxu1 %v1974_v32 }
 0x1d4   :  { %1645 = vmatpush3.bf16.msra.mxu1 %v1908_v60 }
 0x1d5   :  { %1646 = vmatprep.subr.bf16.mxu1 %v1974_v32 }
 0x1d8   :  { %1647 = vmatpush3.bf16.msra.mxu1 %v1909_v61 }
 0x1d9   :  { %1648 = vmatprep.subr.bf16.mxu1 %v1974_v32 }
 0x1dc   :  { %1649 = vmatpush3.bf16.msra.mxu1 %v1910_v62 }
 0x1dd   :  { %1650 = vmatprep.subr.bf16.mxu1 %v1974_v32 }
 0x1e0   :  { %1651 = vmatpush3.bf16.msra.mxu1 %v1911_v63 }
 0x1e1   :  { %1656 = vmatprep.subr.bf16.mxu1 %v1974_v32 }
 0x296   :  { %v1612_v0 = vpop.f32.mrb[4].mxu1 }
 0x297   :  { %v1613_v2 = vpop.f32.mrb[5].mxu1 }
 0x298   :  { %v1614_v3 = vadd.f32 %v1613_v2, %v1612_v0  ;;  %v1615_v4 = vpop.f32.mrb[6].mxu1 }
 0x299   :  { %v1616_v5 = vpop.f32.mrb[7].mxu1 }
 0x29a   :  { %v1195_v6 = vadd.f32 %v1614_v3, %v1561_v1 }
 0x29c   :  { %v1200_v7 = vmax.f32 %v1195_v6, 0.0 }
 0x29e   :  { %v1201_v9 = vpack.c.bf16 %v1200_v7, %v1200_v7 }
 0x2a0   :  { %1653 = vmatmul.mubr.bf16.vlgmr.msra.gmra.mrb[8].mxu1 %v1201_v9 }
 0x2a1   :  { %1657 = vmatpush3.bf16.msra.mxu1 %v1912_v8  ;;  %1672 = vmatprep.mubr.msk.bf16.mxu1 %vm1975_vm0, %v1974_v32 }
 0x2a2   :  { %1658 = vmatprep.subr.bf16.mxu1 %v1974_v32 }
 0x2a5   :  { %1659 = vmatpush3.bf16.msra.mxu1 %v1913_v10 }
 0x2a6   :  { %1660 = vmatprep.subr.bf16.mxu1 %v1974_v32 }
 0x2a9   :  { %1661 = vmatpush3.bf16.msra.mxu1 %v1914_v11 }
 0x2aa   :  { %1662 = vmatprep.subr.bf16.mxu1 %v1974_v32 }
 0x2ad   :  { %1663 = vmatpush3.bf16.msra.mxu1 %v1915_v12 }
 0x2ae   :  { %1664 = vmatprep.subr.bf16.mxu1 %v1974_v32 }
 0x2b1   :  { %1665 = vmatpush3.bf16.msra.mxu1 %v1916_v13 }
 0x2b2   :  { %1666 = vmatprep.subr.bf16.mxu1 %v1974_v32 }
 0x2b5   :  { %1667 = vmatpush3.bf16.msra.mxu1 %v1917_v14 }
 0x2b6   :  { %1668 = vmatprep.subr.bf16.mxu1 %v1974_v32 }
 0x2b9   :  { %1669 = vmatpush3.bf16.msra.mxu1 %v1918_v15 }
 0x2ba   :  { %1670 = vmatprep.subr.bf16.mxu1 %v1974_v32 }
 0x2bd   :  { %1671 = vmatpush3.bf16.msra.mxu1 %v1919_v16 }
 0x373   :  { %v1307_v18 = vpop.f32.mrb[8].mxu1 }
 0x374   :  { %v1308_v19 = vadd.f32 %v1578_v17, %v1307_v18  ;;  %v1654_v20 = vpop.f32.mrb[9].mxu1 }
 0x375   :  { %v1310_v21 = vpop.f32.mrb[10].mxu1 }
 0x376   :  { %v1313_v22 = vmax.f32 %v1308_v19, 0.0  ;;  %v1655_v23 = vpop.f32.mrb[11].mxu1 }
 0x378   :  { %v1314_v24 = vpack.c.bf16 %v1313_v22, %v1313_v22 }
 0x37a   :  { %1673 = vmatmul.mubr.bf16.vlgmr.msra.gmra.mrb[12].mxu1 %v1314_v24 }
 0x44d   :  { %v1420_v26 = vpop.f32.mrb[12].mxu1 }
 0x44e   :  { %v1421_v27 = vadd.f32 %v1587_v25, %v1420_v26  ;;  %v1674_v28 = vpop.f32.mrb[13].mxu1 }
 0x44f   :  { %v1423_v29 = vpop.f32.mrb[14].mxu1 }
 0x450   :  { %1426 = vst [vmem:[%s2188_s9] sm:$0xff] %v1421_v27  ;;  %v1675_v30 = vpop.f32.mrb[15].mxu1 }
 0x451   :  { %1431 = vsyncpa [#allocation3], 1 }
 0x452   :  { %1432 = vsyncpa [#allocation5], 1 }

</bundles_post_ra>
